<compile_context>
chip_gen: v5e
topology: v5e:2x2
jax: 0.10.0
libtpu: 0.0.40
codegen_flags: <defaults>
</compile_context>

<pallas_src>
import math

import jax
import jax.numpy as jnp
from jax.experimental import pallas as pl
from jax.experimental.pallas import tpu as pltpu


def _relation_gru_kernel(x_ref, h_ref, hr_ref, wcat_ref, un_ref, bn_ref, out_ref):
    """One row-tile of the fused, lane-packed RelationGRU step.

    x_ref   : (tile, lw)   packed x rows (lw = pack * d lanes, 128 for d=32)
    h_ref   : (L, lw)      one period of the packed h pattern
    hr_ref  : (L, lw)      one period of packed (h @ Wr_h^T + b_r)
    wcat_ref: (lw, 2*lw)   [blockdiag(Wr_x^T) | blockdiag(Wn^T)]
    un_ref  : (lw, lw)     blockdiag(Un^T)
    bn_ref  : (1, lw)      packed (Wn_b + Un_b)
    out_ref : (tile, lw)   packed n_t
    """
    tile, lw = out_ref.shape
    x = x_ref[...].astype(jnp.float32)

    # Constant h terms cover one period of L packed rows; broadcast to the
    # tile (pure sublane broadcast when L == 1, a sublane tile otherwise).
    L = h_ref.shape[0]
    h = h_ref[...]
    hr = hr_ref[...]
    if L > 1 and tile != L:
        reps = tile // L
        h = jnp.tile(h, (reps, 1))
        hr = jnp.tile(hr, (reps, 1))

    # One wide x-side matmul; the r / n split lands on the lane-`lw`
    # boundary (a vreg boundary when lw is a multiple of 128 - the normal,
    # packed case), so no mid-vreg relayout is needed.
    xw = jnp.dot(x, wcat_ref[...], preferred_element_type=jnp.float32)

    r = jax.nn.sigmoid(xw[:, :lw] + hr)
    n_t = jnp.tanh(
        xw[:, lw:]
        + jnp.dot(r * h, un_ref[...], preferred_element_type=jnp.float32)
        + bn_ref[...])

    # z / ht from the PyTorch forward never influence the returned value
    # (h is never reassigned; only n_t is stacked), so they are omitted.
    out_ref[...] = n_t.astype(out_ref.dtype)


def _choose_pack(M, d, target_lanes=128):
    """Fold `pack` consecutive rows into the lane axis so pack*d ~ 128."""
    for k in range(max(1, target_lanes // d), 0, -1):
        if M % k == 0:
            return k
    return 1


def _choose_tile_rows(Mp, period, bytes_per_row, target_bytes=4 << 20):
    """Largest packed-row tile that divides Mp, satisfies the (8, 128)
    sublane rule, starts on a period boundary, and stays <= target_bytes.
    A grid split is only produced when the whole problem exceeds the budget,
    so tiny inputs run as a single grid step (per-step overhead ~0.35us)."""
    if Mp * bytes_per_row <= target_bytes:
        return Mp
    best = None
    limit = min(Mp, max(1, target_bytes // bytes_per_row))
    for t in range(1, limit + 1):
        if Mp % t:
            continue
        if t % period:
            continue
        if t % 8 and t != Mp:
            continue
        best = t
    return best if best is not None else Mp


def _block_diag(w, k):
    """(d, d) -> (k*d, k*d) block diagonal with k copies of w."""
    return jax.scipy.linalg.block_diag(*([w] * k))


def relation_gru(x_seq, h, params, *, target_bytes=4 << 20):
    """x_seq: (T, B, d), h: (B, d)  ->  (T, B, d) stack of n_t (matches PyTorch)."""
    T, B, d = x_seq.shape
    M = T * B

    # Lane packing: fold `pack` consecutive rows of the (M, d) flatten into
    # the lane axis -> lw = pack * d (= 128 for d = 32).  Free contiguous view.
    pack = _choose_pack(M, d)
    lw = pack * d
    Mp = M // pack
    x2 = x_seq.reshape(Mp, lw)

    # The packed h pattern repeats every L packed rows (L = lcm(B, pack)/pack).
    # Only that single period is materialized and DMA'd; the kernel broadcasts.
    period_flat = (B * pack) // math.gcd(B, pack)
    L = period_flat // pack
    reps = period_flat // B
    h_pack = jnp.tile(h, (reps, 1)).reshape(L, lw)
    hr_pack = jnp.tile(h @ params["Wr_w"][:, d:].T + params["Wr_b"],
                       (reps, 1)).reshape(L, lw)

    # Block-diagonal, lane-packed weights.  w_cat = [bd(Wr_x^T) | bd(Wn^T)]
    # so the in-kernel r/n split falls on the lane-`lw` (vreg) boundary.
    w_cat = jnp.concatenate([_block_diag(params["Wr_w"][:, :d].T, pack),
                             _block_diag(params["Wn_w"].T, pack)], axis=1)
    un = _block_diag(params["Un_w"].T, pack)
    bn = jnp.tile((params["Wn_b"] + params["Un_b"]).reshape(1, d), (1, pack))

    itemsize = jnp.dtype(x_seq.dtype).itemsize
    tile_rows = _choose_tile_rows(Mp, L, lw * itemsize, target_bytes=target_bytes)
    assert Mp % tile_rows == 0 and tile_rows % L == 0

    row_spec = pl.BlockSpec((tile_rows, lw), lambda i: (i, 0))
    # Constant blocks: fetched once, VMEM-resident across the whole grid.
    h_spec = pl.BlockSpec((L, lw), lambda i: (0, 0))
    wcat_spec = pl.BlockSpec((lw, 2 * lw), lambda i: (0, 0))
    un_spec = pl.BlockSpec((lw, lw), lambda i: (0, 0))
    bn_spec = pl.BlockSpec((1, lw), lambda i: (0, 0))

    out = pl.pallas_call(
        _relation_gru_kernel,
        out_shape=jax.ShapeDtypeStruct((Mp, lw), x_seq.dtype),
        grid_spec=pltpu.PrefetchScalarGridSpec(
            num_scalar_prefetch=0,
            grid=(Mp // tile_rows,),
            in_specs=[row_spec, h_spec, h_spec, wcat_spec, un_spec, bn_spec],
            out_specs=row_spec,
        ),
        compiler_params=pltpu.CompilerParams(
            dimension_semantics=("parallel",)),
    )(x2, h_pack, hr_pack, w_cat, un, bn)
    # (Mp, lw) -> (M, d) is a free contiguous view (groups of `pack` rows).
    return out.reshape(T, B, d)


def _reference(x_seq, h, params):
    """Pure-JAX port of the PyTorch forward (only n_t matters for the output)."""
    d = h.shape[-1]
    wrx = params["Wr_w"][:, :d].T
    wrh = params["Wr_w"][:, d:].T
    outs = []
    for t in range(x_seq.shape[0]):
        x = x_seq[t]
        r = jax.nn.sigmoid(x @ wrx + h @ wrh + params["Wr_b"])
        n_t = jnp.tanh(x @ params["Wn_w"].T + params["Wn_b"]
                       + (r * h) @ params["Un_w"].T + params["Un_b"])
        outs.append(n_t)
    return jnp.stack(outs)


if __name__ == "__main__":
    d, T, B = 32, 8, 2
    key = jax.random.PRNGKey(0)
    k = jax.random.split(key, 10)

    # Deterministic parameter init (shapes from nn.Linear in __init__).
    params = {
        "Wr_w": jax.random.normal(k[0], (d, 2 * d), jnp.float32) * 0.1,
        "Wr_b": jax.random.normal(k[1], (d,), jnp.float32) * 0.1,
        # Wz exists in the module but never influences the returned value.
        "Wz_w": jax.random.normal(k[2], (d, 2 * d), jnp.float32) * 0.1,
        "Wz_b": jax.random.normal(k[3], (d,), jnp.float32) * 0.1,
        "Wn_w": jax.random.normal(k[4], (d, d), jnp.float32) * 0.1,
        "Wn_b": jax.random.normal(k[5], (d,), jnp.float32) * 0.1,
        "Un_w": jax.random.normal(k[6], (d, d), jnp.float32) * 0.1,
        "Un_b": jax.random.normal(k[7], (d,), jnp.float32) * 0.1,
    }

    x_seq = jax.random.normal(k[8], (T, B, d), jnp.float32)
    h = jax.random.normal(k[9], (B, d), jnp.float32)

    out = relation_gru(x_seq, h, params)
    out = jax.block_until_ready(out)

    ref = _reference(x_seq, h, params)
    assert out.shape == (T, B, d)
    assert jnp.allclose(out, ref, rtol=1e-5, atol=1e-5), "mismatch vs reference"

    print("KERNEL_OK")
</pallas_src>

<mosaic_0001>
module attributes {stable_mosaic.version = 11 : i64} {
  func.func @_relation_gru_kernel(%arg0: i32, %arg1: memref<4x128xf32, #tpu.memory_space<vmem>>, %arg2: memref<1x128xf32, #tpu.memory_space<vmem>>, %arg3: memref<1x128xf32, #tpu.memory_space<vmem>>, %arg4: memref<128x256xf32, #tpu.memory_space<vmem>>, %arg5: memref<128x128xf32, #tpu.memory_space<vmem>>, %arg6: memref<1x128xf32, #tpu.memory_space<vmem>>, %arg7: memref<4x128xf32, #tpu.memory_space<vmem>>) attributes {dimension_semantics = [#tpu.dimension_semantics<parallel>], iteration_bounds = array<i64: 1>, scalar_prefetch = 0 : i64, scratch_operands = 0 : i64, tpu.core_type = #tpu.core_type<tc>, window_params = [{transform_indices = @transform_0, window_bounds = array<i64: 4, 128>}, {pipeline_mode = #tpu.pipeline_mode<synchronous>, transform_indices = @transform_1, window_bounds = array<i64: 1, 128>}, {pipeline_mode = #tpu.pipeline_mode<synchronous>, transform_indices = @transform_2, window_bounds = array<i64: 1, 128>}, {pipeline_mode = #tpu.pipeline_mode<synchronous>, transform_indices = @transform_3, window_bounds = array<i64: 128, 256>}, {pipeline_mode = #tpu.pipeline_mode<synchronous>, transform_indices = @transform_4, window_bounds = array<i64: 128, 128>}, {pipeline_mode = #tpu.pipeline_mode<synchronous>, transform_indices = @transform_5, window_bounds = array<i64: 1, 128>}, {transform_indices = @transform_6, window_bounds = array<i64: 4, 128>}]} {
    %c0 = arith.constant 0 : index
    %c0_0 = arith.constant 0 : index
    %0 = vector.load %arg1[%c0, %c0_0] : memref<4x128xf32, #tpu.memory_space<vmem>>, vector<4x128xf32>
    %c0_1 = arith.constant 0 : index
    %c0_2 = arith.constant 0 : index
    %1 = vector.load %arg2[%c0_1, %c0_2] : memref<1x128xf32, #tpu.memory_space<vmem>>, vector<1x128xf32>
    %c0_3 = arith.constant 0 : index
    %c0_4 = arith.constant 0 : index
    %2 = vector.load %arg3[%c0_3, %c0_4] : memref<1x128xf32, #tpu.memory_space<vmem>>, vector<1x128xf32>
    %c0_5 = arith.constant 0 : index
    %c0_6 = arith.constant 0 : index
    %3 = vector.load %arg4[%c0_5, %c0_6] : memref<128x256xf32, #tpu.memory_space<vmem>>, vector<128x256xf32>
    %cst = arith.constant dense<0.000000e+00> : vector<4x256xf32>
    %4 = tpu.matmul %0, %3, %cst {dimension_numbers = #tpu.dot_dimension_numbers<[1], [0], [0], [1], [0, 0, 1, 1], [], []>} : vector<4x128xf32>, vector<128x256xf32>, vector<4x256xf32> -> vector<4x256xf32>
    %5 = vector.extract_strided_slice %4 {offsets = [0, 0], sizes = [4, 128], strides = [1, 1]} : vector<4x256xf32> to vector<4x128xf32>
    %6 = vector.broadcast %2 : vector<1x128xf32> to vector<4x128xf32>
    %7 = arith.addf %5, %6 : vector<4x128xf32>
    %8 = arith.negf %7 : vector<4x128xf32>
    %9 = math.exp %8 : vector<4x128xf32>
    %cst_7 = arith.constant 1.000000e+00 : f32
    %10 = vector.broadcast %cst_7 : f32 to vector<4x128xf32>
    %11 = arith.addf %10, %9 : vector<4x128xf32>
    %12 = arith.divf %10, %11 : vector<4x128xf32>
    %13 = vector.extract_strided_slice %4 {offsets = [0, 128], sizes = [4, 128], strides = [1, 1]} : vector<4x256xf32> to vector<4x128xf32>
    %14 = vector.broadcast %1 : vector<1x128xf32> to vector<4x128xf32>
    %15 = arith.mulf %12, %14 : vector<4x128xf32>
    %c0_8 = arith.constant 0 : index
    %c0_9 = arith.constant 0 : index
    %16 = vector.load %arg5[%c0_8, %c0_9] : memref<128x128xf32, #tpu.memory_space<vmem>>, vector<128x128xf32>
    %cst_10 = arith.constant dense<0.000000e+00> : vector<4x128xf32>
    %17 = tpu.matmul %15, %16, %cst_10 {dimension_numbers = #tpu.dot_dimension_numbers<[1], [0], [0], [1], [0, 0, 1, 1], [], []>} : vector<4x128xf32>, vector<128x128xf32>, vector<4x128xf32> -> vector<4x128xf32>
    %18 = arith.addf %13, %17 : vector<4x128xf32>
    %c0_11 = arith.constant 0 : index
    %c0_12 = arith.constant 0 : index
    %19 = vector.load %arg6[%c0_11, %c0_12] : memref<1x128xf32, #tpu.memory_space<vmem>>, vector<1x128xf32>
    %20 = vector.broadcast %19 : vector<1x128xf32> to vector<4x128xf32>
    %21 = arith.addf %18, %20 : vector<4x128xf32>
    %22 = math.tanh %21 : vector<4x128xf32>
    %c0_13 = arith.constant 0 : index
    %c0_14 = arith.constant 0 : index
    %23 = vector.load %arg7[%c0_13, %c0_14] : memref<4x128xf32, #tpu.memory_space<vmem>>, vector<4x128xf32>
    tpu.vector_store %arg7[%c0_13, %c0_14], %22 {strides = array<i32>} : memref<4x128xf32, #tpu.memory_space<vmem>>, vector<4x128xf32>,
    return
  }
  func.func @transform_0(%arg0: i32) -> (i32, i32) {
    %c0_i32 = arith.constant 0 : i32
    %c0_i32_0 = arith.constant 0 : i32
    return %arg0, %c0_i32 : i32, i32
  }
  func.func @transform_1(%arg0: i32) -> (i32, i32) {
    %c0_i32 = arith.constant 0 : i32
    %c0_i32_0 = arith.constant 0 : i32
    %c0_i32_1 = arith.constant 0 : i32
    return %c0_i32, %c0_i32_0 : i32, i32
  }
  func.func @transform_2(%arg0: i32) -> (i32, i32) {
    %c0_i32 = arith.constant 0 : i32
    %c0_i32_0 = arith.constant 0 : i32
    %c0_i32_1 = arith.constant 0 : i32
    return %c0_i32, %c0_i32_0 : i32, i32
  }
  func.func @transform_3(%arg0: i32) -> (i32, i32) {
    %c0_i32 = arith.constant 0 : i32
    %c0_i32_0 = arith.constant 0 : i32
    %c0_i32_1 = arith.constant 0 : i32
    return %c0_i32, %c0_i32_0 : i32, i32
  }
  func.func @transform_4(%arg0: i32) -> (i32, i32) {
    %c0_i32 = arith.constant 0 : i32
    %c0_i32_0 = arith.constant 0 : i32
    %c0_i32_1 = arith.constant 0 : i32
    return %c0_i32, %c0_i32_0 : i32, i32
  }
  func.func @transform_5(%arg0: i32) -> (i32, i32) {
    %c0_i32 = arith.constant 0 : i32
    %c0_i32_0 = arith.constant 0 : i32
    %c0_i32_1 = arith.constant 0 : i32
    return %c0_i32, %c0_i32_0 : i32, i32
  }
  func.func @transform_6(%arg0: i32) -> (i32, i32) {
    %c0_i32 = arith.constant 0 : i32
    %c0_i32_0 = arith.constant 0 : i32
    return %arg0, %c0_i32 : i32, i32
  }
}

</mosaic_0001>

<bundles_post_ra>
// kernel: tpu_custom_call.1
= control target key start
LH: loop header
LB: loop body
LE: loop exit
PB: predicated region body
PF: predicated region fallthrough
CT: control target
= control target key end

     0   :  { %11 = vsyncpa [#allocation3], 0  ;;  %s464_s0 = inlined_call_operand.hbm [shape: f32[4,128], index: 0, kind: input, shape index: {}]   ;;  %s465_s1 = inlined_call_operand.hbm [shape: f32[1,128], index: 1, kind: input, shape index: {}]   ;;  %s466_s2 = inlined_call_operand.vmem [shape: f32[1,128], index: 2, kind: input, shape index: {}]   ;;  %s467_s3 = inlined_call_operand.hbm [shape: f32[128,256], index: 3, kind: input, shape index: {}]   ;;  %s468_s4 = inlined_call_operand.hbm [shape: f32[128,128], index: 4, kind: input, shape index: {}]   ;;  %s469_s5 = inlined_call_operand.vmem [shape: f32[1,128], index: 5, kind: input, shape index: {}]   ;;  %s470_s6 = inlined_call_operand.hbm [shape: f32[4,128], index: 6, kind: output, shape index: {}]  }
   0x1   :  { %12 = vsyncpa [#allocation6], 0 }
   0x2   :  { %13 = vsyncpa [#allocation9], 0  ;;  %s31_s23 = sshll.u32 %s465_s1, 4  ;;  %s32_s23 = int_to_ptr.hbm [resolvable:$true] %s31_s23 }
   0x3   :  { %14 = vsyncpa [#allocation4], 0  ;;  %s395_s24 = smov [#allocation5]   ;;  %s20_s28 = sshll.u32 %s464_s0, 4  ;;  %s21_s28 = int_to_ptr.hbm [resolvable:$true] %s20_s28 }
   0x4   :  { %s33_s25 = sshll.u32 %s395_s24, 4  ;;  %s396_s29 = smov [#allocation2]   ;;  %s34_s25 = int_to_ptr.vmem [resolvable:$true] %s33_s25 }
   0x5   :  { %36 = dma.hbm_to_vmem [thread:$0]  %s32_s23, 16, %s34_s25, [#allocation6]  }
   0x6   :  { %s22_s30 = sshll.u32 %s396_s29, 4  ;;  %s43_s9 = sshll.u32 %s467_s3, 4  ;;  %s23_s30 = int_to_ptr.vmem [resolvable:$true] %s22_s30  ;;  %s44_s9 = int_to_ptr.hbm [resolvable:$true] %s43_s9 }
   0x7   :  { %25 = dma.hbm_to_vmem [thread:$0]  %s21_s28, 64, %s23_s30, [#allocation3]  }
   0x8   :  { %s397_s1 = smov [#allocation7]   ;;  %s56_s13 = sshll.u32 %s468_s4, 4  ;;  %s57_s13 = int_to_ptr.hbm [resolvable:$true] %s56_s13 }
   0x9   :  { %s45_s10 = sshll.u32 %s397_s1, 4  ;;  %s398_s14 = smov 256   ;;  %s46_s10 = int_to_ptr.vmem [resolvable:$true] %s45_s10 }
   0xa   :  { %s399_s0 = smov 16   ;;  %s400_s15 = smov [#allocation8]  }
   0xb   :  { %51 = dma.hbm_to_vmem [thread:$0]  %s44_s9, 4096, %s46_s10, [#allocation6], %s398_s14, %s398_s14, %s399_s0  }
   0xc   :  { %s58_s16 = sshll.u32 %s400_s15, 4  ;;  %s401_s17 = smov 128   ;;  %s59_s16 = int_to_ptr.vmem [resolvable:$true] %s58_s16 }
   0xd   :  { %s402_s18 = smov 8  }
   0xe   :  { %64 = dma.hbm_to_vmem [thread:$0]  %s57_s13, 2048, %s59_s16, [#allocation9], %s401_s17, %s401_s17, %s402_s18  }
   0xf   :  { %387 = dma.done.wait [#allocation3], 64  }
  0x10   :  { %388 = vsyncadd [#allocation3], 4294967232 }
  0x11   :  { %389 = dma.done.wait [#allocation6], 4112  }
  0x12   :  { %390 = vsyncadd [#allocation6], 4294963184 }
  0x13   :  { %391 = dma.done.wait [#allocation9], 2048  }
  0x14   :  { %392 = vsyncadd [#allocation9], 4294965248  ;;  %v116_v0 = vld [vmem:[#allocation7 + $0xf0] sm:$0xff]  ;;  %v114_v1 = vld [vmem:[#allocation7 + $0xe0] sm:$0xff]  ;;  %s403_s20 = smov [#allocation10]   ;;  %s236_s24 = sshll.u32 %s470_s6, 4  ;;  %s237_s24 = int_to_ptr.hbm [resolvable:$true] %s236_s24 }
  0x15   :  { %118 = vmatpush.msra.mxu0 %v116_v0  ;;  %v112_v2 = vld [vmem:[#allocation7 + $0xd0] sm:$0xff]  ;;  %v110_v3 = vld [vmem:[#allocation7 + $0xc0] sm:$0xff]  ;;  %v451_v16 = vld [vmem:[#allocation2] sm:$0xf]  ;;  %s234_s21 = sshll.u32 %s403_s20, 4  ;;  %s235_s21 = int_to_ptr.vmem [resolvable:$true] %s234_s21 }
  0x16   :  { %v108_v4 = vld [vmem:[#allocation7 + $0xb0] sm:$0xff]  ;;  %v106_v5 = vld [vmem:[#allocation7 + $0xa0] sm:$0xff]  ;;  %v200_v17 = vld [vmem:[#allocation8 + $0x78] sm:$0xff] }
  0x17   :  { %119 = vmatpush.msra.mxu0 %v114_v1  ;;  %v104_v6 = vld [vmem:[#allocation7 + $0x90] sm:$0xff]  ;;  %v102_v7 = vld [vmem:[#allocation7 + $0x80] sm:$0xff]  ;;  %201 = vmatpush.msra.mxu2 %v200_v17  ;;  %v198_v19 = vld [vmem:[#allocation8 + $0x68] sm:$0xff] }
  0x18   :  { %v100_v8 = vld [vmem:[#allocation7 + $0x70] sm:$0xff]  ;;  %v98_v9 = vld [vmem:[#allocation7 + $0x60] sm:$0xff]  ;;  %v117_v20 = vld [vmem:[#allocation7 + $0xf8] sm:$0xff] }
  0x19   :  { %120 = vmatpush.msra.mxu0 %v112_v2  ;;  %v96_v10 = vld [vmem:[#allocation7 + $0x50] sm:$0xff]  ;;  %v94_v11 = vld [vmem:[#allocation7 + $0x40] sm:$0xff]  ;;  %138 = vmatpush.msra.mxu1 %v117_v20  ;;  %v115_v22 = vld [vmem:[#allocation7 + $0xe8] sm:$0xff] }
  0x1a   :  { %v92_v12 = vld [vmem:[#allocation7 + $0x30] sm:$0xff]  ;;  %v90_v13 = vld [vmem:[#allocation7 + $0x20] sm:$0xff]  ;;  %v196_v23 = vld [vmem:[#allocation8 + $0x58] sm:$0xff] }
  0x1b   :  { %121 = vmatpush.msra.mxu0 %v110_v3  ;;  %v88_v14 = vld [vmem:[#allocation7 + $0x10] sm:$0xff]  ;;  %v86_v15 = vld [vmem:[#allocation7] sm:$0xff]  ;;  %139 = vmatpush.msra.mxu1 %v115_v22  ;;  %v113_v24 = vld [vmem:[#allocation7 + $0xd8] sm:$0xff] }
  0x1c   :  { %v199_v18 = vld [vmem:[#allocation8 + $0x70] sm:$0xff]  ;;  %v197_v21 = vld [vmem:[#allocation8 + $0x60] sm:$0xff]  ;;  %v111_v26 = vld [vmem:[#allocation7 + $0xc8] sm:$0xff] }
  0x1d   :  { %122 = vmatpush.msra.mxu0 %v108_v4  ;;  %202 = vmatpush.msra.mxu2 %v199_v18  ;;  %v195_v25 = vld [vmem:[#allocation8 + $0x50] sm:$0xff]  ;;  %v194_v27 = vld [vmem:[#allocation8 + $0x48] sm:$0xff]  ;;  %v109_v28 = vld [vmem:[#allocation7 + $0xb8] sm:$0xff] }
  0x1e   :  { %140 = vmatpush.msra.mxu1 %v113_v24  ;;  %v193_v29 = vld [vmem:[#allocation8 + $0x40] sm:$0xff]  ;;  %v107_v30 = vld [vmem:[#allocation7 + $0xa8] sm:$0xff]  ;;  %v192_v31 = vld [vmem:[#allocation8 + $0x38] sm:$0xff] }
  0x1f   :  { %123 = vmatpush.msra.mxu0 %v106_v5  ;;  %203 = vmatpush.msra.mxu2 %v198_v19  ;;  %v105_v32 = vld [vmem:[#allocation7 + $0x98] sm:$0xff]  ;;  %v191_v33 = vld [vmem:[#allocation8 + $0x30] sm:$0xff]  ;;  %v103_v34 = vld [vmem:[#allocation7 + $0x88] sm:$0xff] }
  0x20   :  { %141 = vmatpush.msra.mxu1 %v111_v26  ;;  %v190_v35 = vld [vmem:[#allocation8 + $0x28] sm:$0xff]  ;;  %v101_v36 = vld [vmem:[#allocation7 + $0x78] sm:$0xff]  ;;  %v189_v37 = vld [vmem:[#allocation8 + $0x20] sm:$0xff] }
  0x21   :  { %124 = vmatpush.msra.mxu0 %v104_v6  ;;  %204 = vmatpush.msra.mxu2 %v197_v21  ;;  %v99_v38 = vld [vmem:[#allocation7 + $0x68] sm:$0xff]  ;;  %v188_v39 = vld [vmem:[#allocation8 + $0x18] sm:$0xff]  ;;  %v187_v41 = vld [vmem:[#allocation8 + $0x10] sm:$0xff] }
  0x22   :  { %142 = vmatpush.msra.mxu1 %v109_v28  ;;  %v97_v40 = vld [vmem:[#allocation7 + $0x58] sm:$0xff]  ;;  %v95_v42 = vld [vmem:[#allocation7 + $0x48] sm:$0xff]  ;;  %v185_v46 = vld [vmem:[#allocation8] sm:$0xff] }
  0x23   :  { %125 = vmatpush.msra.mxu0 %v102_v7  ;;  %205 = vmatpush.msra.mxu2 %v196_v23  ;;  %v186_v43 = vld [vmem:[#allocation8 + $0x8] sm:$0xff]  ;;  %v258_v44 = vld [vmem:[%s466_s2] ss:$0 sm:$0xff]  ;;  %v259_v62 = vld [vmem:[#allocation5] ss:$0 sm:$0xff] }
  0x24   :  { %143 = vmatpush.msra.mxu1 %v107_v30  ;;  %v93_v45 = vld [vmem:[#allocation7 + $0x38] sm:$0xff]  ;;  %v91_v49 = vld [vmem:[#allocation7 + $0x28] sm:$0xff] }
  0x25   :  { %126 = vmatpush.msra.mxu0 %v100_v8  ;;  %206 = vmatpush.msra.mxu2 %v195_v25  ;;  %v89_v50 = vld [vmem:[#allocation7 + $0x18] sm:$0xff]  ;;  %v87_v52 = vld [vmem:[#allocation7 + $0x8] sm:$0xff] }
  0x26   :  { %144 = vmatpush.msra.mxu1 %v105_v32  ;;  %v260_v4 = vld [vmem:[%s469_s5] ss:$0 sm:$0xff] }
  0x27   :  { %127 = vmatpush.msra.mxu0 %v98_v9  ;;  %207 = vmatpush.msra.mxu2 %v194_v27 }
  0x28   :  { %145 = vmatpush.msra.mxu1 %v103_v34 }
  0x29   :  { %128 = vmatpush.msra.mxu0 %v96_v10  ;;  %208 = vmatpush.msra.mxu2 %v193_v29 }
  0x2a   :  { %146 = vmatpush.msra.mxu1 %v101_v36 }
  0x2b   :  { %129 = vmatpush.msra.mxu0 %v94_v11  ;;  %209 = vmatpush.msra.mxu2 %v192_v31 }
  0x2c   :  { %147 = vmatpush.msra.mxu1 %v99_v38 }
  0x2d   :  { %130 = vmatpush.msra.mxu0 %v92_v12  ;;  %210 = vmatpush.msra.mxu2 %v191_v33 }
  0x2e   :  { %148 = vmatpush.msra.mxu1 %v97_v40 }
  0x2f   :  { %131 = vmatpush.msra.mxu0 %v90_v13  ;;  %211 = vmatpush.msra.mxu2 %v190_v35 }
  0x30   :  { %149 = vmatpush.msra.mxu1 %v95_v42 }
  0x31   :  { %132 = vmatpush.msra.mxu0 %v88_v14  ;;  %212 = vmatpush.msra.mxu2 %v189_v37 }
  0x32   :  { %150 = vmatpush.msra.mxu1 %v93_v45 }
  0x33   :  { %133 = vmatpush.msra.mxu0 %v86_v15  ;;  %213 = vmatpush.msra.mxu2 %v188_v39 }
  0x34   :  { %134 = vmatmul.f32.vlgmr.msra.gmra.mxu0 %v451_v16  ;;  %151 = vmatpush.msra.mxu1 %v91_v49 }
  0x35   :  { %214 = vmatpush.msra.mxu2 %v187_v41 }
  0x36   :  { %152 = vmatpush.msra.mxu1 %v89_v50 }
  0x37   :  { %215 = vmatpush.msra.mxu2 %v186_v43 }
  0x38   :  { %153 = vmatpush.msra.mxu1 %v87_v52 }
  0x39   :  { %216 = vmatpush.msra.mxu2 %v185_v46  ;;  %154 = vmatmul.f32.vlgmr.msra.gmra.mxu1 %v451_v16 }
  0xb1   :  { %v135_v47 = vpop.f32.mrf.mxu0 }
  0xb2   :  { %v161_v48 = vadd.f32 %v258_v44, %v135_v47 }
  0xb4   :  { %v248_v51 = vmul.f32 -1.442695, %v161_v48 }
  0xb6   :  { %261 = vpow2.f32 %v248_v51  ;;  %v155_v3 = vpop.f32.mrf.mxu1 }
  0xbc   :  { %v262_v53 = vpop.eup %261 }
  0xbd   :  { %v165_v54 = vadd.f32 1.0, %v262_v53 }
  0xbf   :  { %263 = vrcp.f32 %v165_v54  ;;  %v177_v58 = vand.u32 2147483648, %v165_v54  ;;  %v175_v60 = vand.u32 2147483647, %v165_v54  ;;  %vm171_vm1 = vweird.f32 %v165_v54 }
  0xc1   :  { %v178_v63 = vor.u32 1.1754944e-38, %v177_v58  ;;  %vm176_vm3 = vcmp.eq.f32.partialorder %v175_v60, 8.507059e+37 }
  0xc5   :  { %v264_v55 = vpop.eup %263 }
  0xc6   :  { %v167_v56 = vmul.f32 %v264_v55, %v165_v54  ;;  %vm172_vm0 = vweird.f32 %v264_v55 }
  0xc7   :  { %vm173_vm2 = vmor %vm171_vm1, %vm172_vm0 }
  0xc8   :  { %v168_v57 = vsub.f32 1.0, %v167_v56 }
  0xca   :  { %v169_v59 = vmul.f32 %v264_v55, %v168_v57 }
  0xcc   :  { %v170_v61 = vadd.f32 %v264_v55, %v169_v59 }
  0xce   :  { %v174_v0 = vsel %vm173_vm2, %v264_v55, %v170_v61 }
  0xcf   :  { %v179_v1 = vsel %vm176_vm3, %v178_v63, %v174_v0 }
  0xd0   :  { %v184_v2 = vmul.f32 %v259_v62, %v179_v1 }
  0xd2   :  { %217 = vmatmul.f32.vlgmr.msra.gmra.mxu2 %v184_v2 }
 0x155   :  { %v218_v5 = vpop.f32.mrf.mxu2 }
 0x156   :  { %v221_v6 = vadd.f32 %v218_v5, %v155_v3 }
 0x158   :  { %v226_v7 = vadd.f32 %v260_v4, %v221_v6 }
 0x15a   :  { %265 = vtanh.f32 %v226_v7 }
 0x160   :  { %v266_v8 = vpop.eup %265 }
 0x161   :  { %228 = vst [vmem:[#allocation10] sm:$0xf] %v266_v8 }
 0x162   :  { %239 = dma.vmem_to_hbm [thread:$0]  %s235_s21, 64, %s237_s24, [#allocation4]  }
 0x163   :  { %393 = dma.done.wait [#allocation4], 64  }
 0x164   :  { %394 = vsyncadd [#allocation4], 4294967232 }
 0x165   :  { %244 = vsyncpa [#allocation3], 1 }
 0x166   :  { %245 = vsyncpa [#allocation6], 1 }
 0x167   :  { %246 = vsyncpa [#allocation9], 1 }
 0x168   :  { %247 = vsyncpa [#allocation4], 1 }

</bundles_post_ra>
